<compile_context>
chip_gen: v5e
topology: v5e:2x2
jax: 0.10.0
libtpu: 0.0.40
codegen_flags: <defaults>
</compile_context>

<pallas_src>
import jax
import jax.numpy as jnp
from jax import lax
from jax.experimental import pallas as pl
from jax.experimental.pallas import tpu as pltpu


def _round_up(x, m):
    return ((x + m - 1) // m) * m


def _combined_rbf_kernel(coef_ref, os_ref, a_ref, bt_ref, out_ref):
    """One grid step = one (TM, TN) tile of ALL K covariance matrices.

    coef_ref : SMEM (K,) f32, precomputed -0.5 / l_k^2
    os_ref   : SMEM (K,) f32, outputscale s_k
    a_ref    : VMEM (TM, D+2) augmented row block  [x, 1, |x|^2]
    bt_ref   : VMEM (D+2, TN) augmented col block  [-2x; |x|^2; 1] (pre-transposed)
    out_ref  : VMEM (K, TM, TN) output tile
    """
    # Pairwise squared distances straight off the MXU, f32 accumulation,
    # native [M,K]x[K,N] contraction (operands augmented/transposed in wrapper).
    d2 = lax.dot_general(a_ref[...], bt_ref[...], (((1,), (0,)), ((), ())),
                         preferred_element_type=jnp.float32)
    d2 = jnp.maximum(d2, 0.0)  # clamp tiny negative cancellation near diagonal

    num_k = out_ref.shape[0]
    if num_k <= 8:
        # Small K: full unroll so exp(k) (EUP) overlaps the store of k-1.
        for k in range(num_k):
            out_ref[k, :, :] = (os_ref[k] * jnp.exp(d2 * coef_ref[k])).astype(out_ref.dtype)
    else:
        # Large K: bounded loop avoids inflating bundle count / vreg live ranges.
        def body(k, carry):
            out_ref[k, :, :] = (os_ref[k] * jnp.exp(d2 * coef_ref[k])).astype(out_ref.dtype)
            return carry
        lax.fori_loop(0, num_k, body, 0)


def _select_tiles(n_pad, d_aug, num_k):
    """Pick (tm, tn) so the double-buffered working set fits a conservative
    ~24 MiB budget (safe on v7x's 64 MiB VMEM), preferring lane-dense tn."""
    budget = 24 * 1024 * 1024

    def est(tm, tn):
        out_b = 2 * num_k * tm * tn * 4            # double-buffered output block
        in_b = 2 * (tm * d_aug + d_aug * tn) * 4   # double-buffered input blocks
        tmp_b = 2 * tm * tn * 4                    # d2 + in-flight exp tile
        return out_b + in_b + tmp_b

    lane_cands = [t for t in (512, 256, 128) if n_pad % t == 0] or [n_pad]
    sub_cands = [t for t in (512, 256, 128, 64, 32, 16, 8) if n_pad % t == 0] or [n_pad]

    tn = lane_cands[-1]
    for cand in lane_cands:                        # largest tn that can fit at all
        if est(sub_cands[-1], cand) <= budget:
            tn = cand
            break

    tm = sub_cands[-1]
    for cand in sub_cands:                         # largest tm that fits the budget
        if est(cand, tn) <= budget:
            tm = cand
            break

    # v7x has 2 TensorCores: if the grid would be a single step, split the row
    # axis so both cores get work (harmless on single-TC v5e/v6e).
    if n_pad // tm == 1 and n_pad // tn == 1:
        for cand in sub_cands:
            if cand < tm and n_pad // cand >= 2:
                tm = cand
                break

    return tm, tn, est(tm, tn)


def combined_kernels(x, lengthscales, outputscales):
    """Apply every RBF kernel to x and stack the results: (K, N, N)."""
    n, d = x.shape
    num_k = lengthscales.shape[0]

    xf = x.astype(jnp.float32)
    sq = jnp.sum(xf * xf, axis=-1, keepdims=True)                       # (N, 1)

    # Augmented operands built ONCE (amortized over all output tiles):
    #   A  = [x, 1, |x|^2]                (N, D+2)
    #   Bt = [-2x, |x|^2, 1]^T            (D+2, N)   =>   A @ Bt = pairwise ||.||^2
    a = jnp.concatenate([xf, jnp.ones_like(sq), sq], axis=-1)
    bt = jnp.concatenate([-2.0 * xf, sq, jnp.ones_like(sq)], axis=-1).T
    d_aug = d + 2

    # Pad N so the lane (last) output dim is a multiple of 128 -> unmasked,
    # lane-dense stores, and no full-extent block fallback at large N.
    if n % 128 == 0:
        n_pad = n
    elif n > 64:
        n_pad = _round_up(n, 128)
    else:
        n_pad = _round_up(n, 8)
    if n_pad != n:
        a = jnp.pad(a, ((0, n_pad - n), (0, 0)))
        bt = jnp.pad(bt, ((0, 0), (0, n_pad - n)))

    # Per-kernel scalar math hoisted out of the kernel.
    coef = -0.5 / (lengthscales.astype(jnp.float32) ** 2)               # (K,)
    osc = outputscales.astype(jnp.float32)                              # (K,)

    tm, tn, est_bytes = _select_tiles(n_pad, d_aug, num_k)
    vmem_limit = int(min(56 * 2**20, max(32 * 2**20, est_bytes + (8 << 20))))

    # TODO(synk): for very large D, add a feature-reduction grid axis that
    # accumulates the Gram into a (tm, tn) scratch instead of full-D blocks.
    out = pl.pallas_call(
        _combined_rbf_kernel,
        out_shape=jax.ShapeDtypeStruct((num_k, n_pad, n_pad), jnp.float32),
        grid=(n_pad // tm, n_pad // tn),
        in_specs=[
            pl.BlockSpec(memory_space=pltpu.MemorySpace.SMEM),      # coef (K,)
            pl.BlockSpec(memory_space=pltpu.MemorySpace.SMEM),      # outputscale (K,)
            pl.BlockSpec((tm, d_aug), lambda i, j: (i, 0)),         # A row block
            pl.BlockSpec((d_aug, tn), lambda i, j: (0, j)),         # Bt col block
        ],
        out_specs=pl.BlockSpec((num_k, tm, tn), lambda i, j: (0, i, j)),
        compiler_params=pltpu.CompilerParams(
            dimension_semantics=("parallel", "parallel"),
            vmem_limit_bytes=vmem_limit,
        ),
    )(coef, osc, a, bt)

    if n_pad != n:
        out = out[:, :n, :n]
    return out


def combined_kernels_ref(x, lengthscales, outputscales):
    """Pure-JAX reference mirroring the PyTorch forward semantics."""
    xf = x.astype(jnp.float32)
    sq = jnp.sum(xf * xf, axis=-1, keepdims=True)
    d2 = jnp.maximum(sq + sq.T - 2.0 * (xf @ xf.T), 0.0)
    covs = [s * jnp.exp(-0.5 * d2 / (l * l)) for l, s in zip(lengthscales, outputscales)]
    return jnp.stack(covs, axis=0)


if __name__ == "__main__":
    # Small shapes consistent with the forward: N=8 points, D=32 features,
    # a "kernel_list" of 4 RBF kernels with deterministic hyperparameters.
    N, D, NUM_KERNELS = 8, 32, 4

    key = jax.random.PRNGKey(0)
    x = jax.random.normal(key, (N, D), dtype=jnp.float32)

    lengthscales = jnp.array([0.5, 1.0, 2.0, 4.0], dtype=jnp.float32)
    outputscales = jnp.array([1.0, 0.5, 2.0, 1.5], dtype=jnp.float32)

    out = combined_kernels(x, lengthscales, outputscales)
    out = jax.block_until_ready(out)

    ref = combined_kernels_ref(x, lengthscales, outputscales)
    assert out.shape == (NUM_KERNELS, N, N)
    assert jnp.allclose(out, ref, atol=1e-4, rtol=1e-4)

    print("KERNEL_OK")
</pallas_src>

<mosaic_0001>
module attributes {stable_mosaic.version = 11 : i64} {
  func.func @_combined_rbf_kernel(%arg0: i32, %arg1: i32, %arg2: memref<4xf32, #tpu.memory_space<smem>>, %arg3: memref<4xf32, #tpu.memory_space<smem>>, %arg4: memref<8x34xf32, #tpu.memory_space<vmem>>, %arg5: memref<34x8xf32, #tpu.memory_space<vmem>>, %arg6: memref<4x8x8xf32, #tpu.memory_space<vmem>>) attributes {dimension_semantics = [#tpu.dimension_semantics<parallel>, #tpu.dimension_semantics<parallel>], iteration_bounds = array<i64: 1, 1>, scalar_prefetch = 0 : i64, scratch_operands = 0 : i64, tpu.core_type = #tpu.core_type<tc>, window_params = [{transform_indices = @transform_0, window_bounds = array<i64: 4>}, {transform_indices = @transform_1, window_bounds = array<i64: 4>}, {transform_indices = @transform_2, window_bounds = array<i64: 8, 34>}, {transform_indices = @transform_3, window_bounds = array<i64: 34, 8>}, {transform_indices = @transform_4, window_bounds = array<i64: 4, 8, 8>}]} {
    %c0 = arith.constant 0 : index
    %c0_0 = arith.constant 0 : index
    %0 = vector.load %arg4[%c0, %c0_0] : memref<8x34xf32, #tpu.memory_space<vmem>>, vector<8x34xf32>
    %c0_1 = arith.constant 0 : index
    %c0_2 = arith.constant 0 : index
    %1 = vector.load %arg5[%c0_1, %c0_2] : memref<34x8xf32, #tpu.memory_space<vmem>>, vector<34x8xf32>
    %cst = arith.constant dense<0.000000e+00> : vector<8x8xf32>
    %2 = tpu.matmul %0, %1, %cst {dimension_numbers = #tpu.dot_dimension_numbers<[1], [0], [0], [1], [0, 0, 1, 1], [], []>} : vector<8x34xf32>, vector<34x8xf32>, vector<8x8xf32> -> vector<8x8xf32>
    %cst_3 = arith.constant 0.000000e+00 : f32
    %3 = vector.broadcast %cst_3 : f32 to vector<8x8xf32>
    %4 = arith.maximumf %2, %3 : vector<8x8xf32>
    %c0_4 = arith.constant 0 : index
    %5 = memref.load %arg3[%c0_4] : memref<4xf32, #tpu.memory_space<smem>>
    %c0_5 = arith.constant 0 : index
    %6 = memref.load %arg2[%c0_5] : memref<4xf32, #tpu.memory_space<smem>>
    %7 = vector.broadcast %6 : f32 to vector<8x8xf32>
    %8 = arith.mulf %4, %7 : vector<8x8xf32>
    %9 = math.exp %8 : vector<8x8xf32>
    %10 = vector.broadcast %5 : f32 to vector<8x8xf32>
    %11 = arith.mulf %10, %9 : vector<8x8xf32>
    %c0_6 = arith.constant 0 : index
    %c0_7 = arith.constant 0 : index
    %c0_8 = arith.constant 0 : index
    %12 = vector.load %arg6[%c0_6, %c0_7, %c0_8] : memref<4x8x8xf32, #tpu.memory_space<vmem>>, vector<1x8x8xf32>
    %13 = vector.shape_cast %12 : vector<1x8x8xf32> to vector<8x8xf32>
    %14 = vector.shape_cast %11 : vector<8x8xf32> to vector<1x8x8xf32>
    tpu.vector_store %arg6[%c0_6, %c0_7, %c0_8], %14 {strides = array<i32>} : memref<4x8x8xf32, #tpu.memory_space<vmem>>, vector<1x8x8xf32>,
    %c1 = arith.constant 1 : index
    %15 = memref.load %arg3[%c1] : memref<4xf32, #tpu.memory_space<smem>>
    %c1_9 = arith.constant 1 : index
    %16 = memref.load %arg2[%c1_9] : memref<4xf32, #tpu.memory_space<smem>>
    %17 = vector.broadcast %16 : f32 to vector<8x8xf32>
    %18 = arith.mulf %4, %17 : vector<8x8xf32>
    %19 = math.exp %18 : vector<8x8xf32>
    %20 = vector.broadcast %15 : f32 to vector<8x8xf32>
    %21 = arith.mulf %20, %19 : vector<8x8xf32>
    %c1_10 = arith.constant 1 : index
    %c0_11 = arith.constant 0 : index
    %c0_12 = arith.constant 0 : index
    %22 = vector.load %arg6[%c1_10, %c0_11, %c0_12] : memref<4x8x8xf32, #tpu.memory_space<vmem>>, vector<1x8x8xf32>
    %23 = vector.shape_cast %22 : vector<1x8x8xf32> to vector<8x8xf32>
    %24 = vector.shape_cast %21 : vector<8x8xf32> to vector<1x8x8xf32>
    tpu.vector_store %arg6[%c1_10, %c0_11, %c0_12], %24 {strides = array<i32>} : memref<4x8x8xf32, #tpu.memory_space<vmem>>, vector<1x8x8xf32>,
    %c2 = arith.constant 2 : index
    %25 = memref.load %arg3[%c2] : memref<4xf32, #tpu.memory_space<smem>>
    %c2_13 = arith.constant 2 : index
    %26 = memref.load %arg2[%c2_13] : memref<4xf32, #tpu.memory_space<smem>>
    %27 = vector.broadcast %26 : f32 to vector<8x8xf32>
    %28 = arith.mulf %4, %27 : vector<8x8xf32>
    %29 = math.exp %28 : vector<8x8xf32>
    %30 = vector.broadcast %25 : f32 to vector<8x8xf32>
    %31 = arith.mulf %30, %29 : vector<8x8xf32>
    %c2_14 = arith.constant 2 : index
    %c0_15 = arith.constant 0 : index
    %c0_16 = arith.constant 0 : index
    %32 = vector.load %arg6[%c2_14, %c0_15, %c0_16] : memref<4x8x8xf32, #tpu.memory_space<vmem>>, vector<1x8x8xf32>
    %33 = vector.shape_cast %32 : vector<1x8x8xf32> to vector<8x8xf32>
    %34 = vector.shape_cast %31 : vector<8x8xf32> to vector<1x8x8xf32>
    tpu.vector_store %arg6[%c2_14, %c0_15, %c0_16], %34 {strides = array<i32>} : memref<4x8x8xf32, #tpu.memory_space<vmem>>, vector<1x8x8xf32>,
    %c3 = arith.constant 3 : index
    %35 = memref.load %arg3[%c3] : memref<4xf32, #tpu.memory_space<smem>>
    %c3_17 = arith.constant 3 : index
    %36 = memref.load %arg2[%c3_17] : memref<4xf32, #tpu.memory_space<smem>>
    %37 = vector.broadcast %36 : f32 to vector<8x8xf32>
    %38 = arith.mulf %4, %37 : vector<8x8xf32>
    %39 = math.exp %38 : vector<8x8xf32>
    %40 = vector.broadcast %35 : f32 to vector<8x8xf32>
    %41 = arith.mulf %40, %39 : vector<8x8xf32>
    %c3_18 = arith.constant 3 : index
    %c0_19 = arith.constant 0 : index
    %c0_20 = arith.constant 0 : index
    %42 = vector.load %arg6[%c3_18, %c0_19, %c0_20] : memref<4x8x8xf32, #tpu.memory_space<vmem>>, vector<1x8x8xf32>
    %43 = vector.shape_cast %42 : vector<1x8x8xf32> to vector<8x8xf32>
    %44 = vector.shape_cast %41 : vector<8x8xf32> to vector<1x8x8xf32>
    tpu.vector_store %arg6[%c3_18, %c0_19, %c0_20], %44 {strides = array<i32>} : memref<4x8x8xf32, #tpu.memory_space<vmem>>, vector<1x8x8xf32>,
    return
  }
  func.func @transform_0(%arg0: i32, %arg1: i32) -> i32 {
    %c0_i32 = arith.constant 0 : i32
    %c0_i32_0 = arith.constant 0 : i32
    return %c0_i32 : i32
  }
  func.func @transform_1(%arg0: i32, %arg1: i32) -> i32 {
    %c0_i32 = arith.constant 0 : i32
    %c0_i32_0 = arith.constant 0 : i32
    return %c0_i32 : i32
  }
  func.func @transform_2(%arg0: i32, %arg1: i32) -> (i32, i32) {
    %c0_i32 = arith.constant 0 : i32
    %c0_i32_0 = arith.constant 0 : i32
    return %arg0, %c0_i32 : i32, i32
  }
  func.func @transform_3(%arg0: i32, %arg1: i32) -> (i32, i32) {
    %c0_i32 = arith.constant 0 : i32
    %c0_i32_0 = arith.constant 0 : i32
    return %c0_i32, %arg1 : i32, i32
  }
  func.func @transform_4(%arg0: i32, %arg1: i32) -> (i32, i32, i32) {
    %c0_i32 = arith.constant 0 : i32
    %c0_i32_0 = arith.constant 0 : i32
    return %c0_i32, %arg0, %arg1 : i32, i32, i32
  }
}

</mosaic_0001>

<bundles_post_ra>
// kernel: tpu_custom_call.1
= control target key start
LH: loop header
LB: loop body
LE: loop exit
PB: predicated region body
PF: predicated region fallthrough
CT: control target
= control target key end

     0   :  { %9 = vsyncpa [#allocation4], 0  ;;  %s274_s0 = inlined_call_operand.vmem [shape: f32[4], index: 0, kind: input, shape index: {}]   ;;  %s275_s1 = inlined_call_operand.vmem [shape: f32[4], index: 1, kind: input, shape index: {}]   ;;  %s276_s2 = inlined_call_operand.vmem [shape: f32[8,34], index: 2, kind: input, shape index: {}]   ;;  %s277_s3 = inlined_call_operand.vmem [shape: f32[34,8], index: 3, kind: input, shape index: {}]   ;;  %s278_s4 = inlined_call_operand.hbm [shape: f32[4,8,8], index: 4, kind: output, shape index: {}]  }
   0x1   :  { %10 = vsyncpa [#allocation6], 0 }
   0x2   :  { %11 = vsyncpa [#allocation3], 0  ;;  %s17_s17 = sshll.u32 %s274_s0, 4  ;;  %s26_s20 = sshll.u32 %s275_s1, 4  ;;  %s18_s17 = int_to_ptr.vmem [resolvable:$true] %s17_s17  ;;  %s27_s20 = int_to_ptr.vmem [resolvable:$true] %s26_s20 }
   0x3   :  { %s213_s21 = smov [#allocation2]   ;;  %s214_s22 = smov [#allocation5]  }
   0x4   :  { %20 = dma.vmem_to_smem %s18_s17, 16, %s213_s21, [#allocation4]  }
   0x5   :  { %29 = dma.vmem_to_smem %s27_s20, 16, %s214_s22, [#allocation6]  }
   0x6   :  { %207 = dma.done.wait [#allocation4], 16  }
   0x7   :  { %208 = vsyncadd [#allocation4], 4294967280 }
   0x8   :  { %209 = dma.done.wait [#allocation6], 16  }
   0x9   :  { %210 = vsyncadd [#allocation6], 4294967280 }
   0xa   :  { %42 = sfence }
   0xb   :  { %v48_v0 = vld [vmem:[%s277_s3 + $0x20] sm:$0x3]  ;;  %vm53_vm0 = vcmask 1041408   ;;  %v47_v1 = vld [vmem:[%s277_s3 + $0x18] sm:$0xff]  ;;  %v46_v2 = vld [vmem:[%s277_s3 + $0x10] sm:$0xff]  ;;  %vm49_vm1 = vcmask 277504  }
   0xc   :  { %138 = vmatpush.msk.msra.mxu0 %vm53_vm0, %v48_v0  ;;  %v45_v3 = vld [vmem:[%s277_s3 + $0x8] sm:$0xff]  ;;  %v44_v4 = vld [vmem:[%s277_s3] sm:$0xff]  ;;  %s79_s7 = sld [smem:[#allocation2]]  ;;  %vm86_vm2 = vcmask 64512   ;;  %s215_s13 = smov [#allocation7]  }
   0xd   :  { %v43_v5 = vld [vmem:[%s276_s2] sm:$0xff]  ;;  %s141_s8 = sld [smem:[#allocation2 + $0x1]]  ;;  %s122_s14 = sshll.u32 %s215_s13, 4  ;;  %s123_s14 = int_to_ptr.vmem [resolvable:$true] %s122_s14 }
   0xe   :  { %69 = vmatpush.msra.mxu0 %v47_v1  ;;  %s143_s9 = sld [smem:[#allocation2 + $0x2]]  ;;  %s124_s17 = sshll.u32 %s278_s4, 4  ;;  %s125_s17 = int_to_ptr.hbm [resolvable:$true] %s124_s17 }
   0xf   :  { %s145_s10 = sld [smem:[#allocation2 + $0x3]]  ;;  %s216_s18 = smov 128  }
  0x10   :  { %70 = vmatpush.msra.mxu0 %v46_v2  ;;  %s78_s11 = sld [smem:[#allocation5]]  ;;  %s217_s4 = smov 8  }
  0x11   :  { %s140_s3 = sld [smem:[#allocation5 + $0x1]] }
  0x12   :  { %71 = vmatpush.msra.mxu0 %v45_v3  ;;  %v80_v7 = vstv %s79_s7  ;;  %s142_s2 = sld [smem:[#allocation5 + $0x2]] }
  0x13   :  { %v90_v8 = vstv %s141_s8  ;;  %s144_s12 = sld [smem:[#allocation5 + $0x3]] }
  0x14   :  { %72 = vmatpush.msra.mxu0 %v44_v4  ;;  %v100_v9 = vstv %s143_s9 }
  0x15   :  { %139 = vmatmul.msk.f32.vlgmr.msra.gmra.mxu0 %vm49_vm1, %v43_v5  ;;  %v110_v10 = vstv %s145_s10 }
  0x16   :  { %v84_v20 = vstv %s78_s11 }
  0x17   :  { %v94_v21 = vstv %s140_s3 }
  0x18   :  { %v104_v23 = vstv %s142_s2 }
  0x19   :  { %v114_v26 = vstv %s144_s12 }
  0x92   :  { %v74_v6 = vpop.f32.mrf.mxu0 }
  0x93   :  { %v77_v11 = vmax.f32 %v74_v6, 0.0 }
  0x95   :  { %v81_v12 = vmul.f32 %v80_v7, %v77_v11  ;;  %v91_v13 = vmul.f32 %v90_v8, %v77_v11  ;;  %v101_v14 = vmul.f32 %v100_v9, %v77_v11  ;;  %v111_v15 = vmul.f32 %v110_v10, %v77_v11 }
  0x97   :  { %v82_v16 = vmul.f32 1.442695, %v81_v12  ;;  %v92_v17 = vmul.f32 1.442695, %v91_v13  ;;  %v102_v18 = vmul.f32 1.442695, %v101_v14 }
  0x98   :  { %v112_v19 = vmul.f32 1.442695, %v111_v15 }
  0x99   :  { %151 = vpow2.f32 %v82_v16 }
  0x9a   :  { %153 = vpow2.f32 %v92_v17 }
  0x9b   :  { %155 = vpow2.f32 %v102_v18 }
  0x9c   :  { %157 = vpow2.f32 %v112_v19 }
  0x9f   :  { %v152_v22 = vpop.eup %151 }
  0xa0   :  { %v154_v24 = vpop.eup %153  ;;  %v85_v25 = vmul.f32 %v152_v22, %v84_v20 }
  0xa1   :  { %v156_v27 = vpop.eup %155  ;;  %v95_v28 = vmul.f32 %v154_v24, %v94_v21 }
  0xa2   :  { %v158_v29 = vpop.eup %157  ;;  %v105_v30 = vmul.f32 %v156_v27, %v104_v23  ;;  %87 = vst.msk [vmem:[#allocation7] sm:$0xff] %vm86_vm2, %v85_v25 }
  0xa3   :  { %v115_v31 = vmul.f32 %v158_v29, %v114_v26  ;;  %97 = vst.msk [vmem:[#allocation7 + $0x8] sm:$0xff] %vm86_vm2, %v95_v28 }
  0xa4   :  { %107 = vst.msk [vmem:[#allocation7 + $0x10] sm:$0xff] %vm86_vm2, %v105_v30 }
  0xa5   :  { %117 = vst.msk [vmem:[#allocation7 + $0x18] sm:$0xff] %vm86_vm2, %v115_v31 }
  0xa6   :  { %130 = dma.vmem_to_hbm [thread:$0]  %s123_s14, 512, %s125_s17, [#allocation3], %s216_s18, %s216_s18, %s217_s4  }
  0xa7   :  { %211 = dma.done.wait [#allocation3], 512  }
  0xa8   :  { %212 = vsyncadd [#allocation3], 4294966784 }
  0xa9   :  { %135 = vsyncpa [#allocation3], 1 }
  0xaa   :  { %136 = vsyncpa [#allocation4], 1 }
  0xab   :  { %137 = vsyncpa [#allocation6], 1 }

</bundles_post_ra>
